<compile_context>
chip_gen: v6e
topology: v6e:2x2x1
jax: 0.10.0
libtpu: 0.0.40
codegen_flags: <defaults>
</compile_context>

<pallas_src>
import functools
import math

import jax
import jax.numpy as jnp
from jax.experimental import pallas as pl
from jax.experimental.pallas import tpu as pltpu

BF = jnp.bfloat16


def _mp(*sems):
    return pltpu.CompilerParams(dimension_semantics=sems,
                                vmem_limit_bytes=32 * 1024 * 1024)


# ------------------------- linear (+bias, +relu), row-tiled -------------------------
def _linear_kernel(x_ref, w_ref, b_ref, o_ref, *, relu):
    y = jax.lax.dot_general(x_ref[...].astype(BF), w_ref[...],
                            (((1,), (0,)), ((), ())),
                            preferred_element_type=jnp.float32)
    y = y + b_ref[...]
    if relu:
        y = jnp.maximum(y, 0.0)
    o_ref[...] = y


def linear(x, w, b=None, relu=False, block_m=512):
    M, K = x.shape
    N = w.shape[1]
    if b is None:
        b = jnp.zeros((N,), jnp.float32)
    tm = min(block_m, M)
    grid = (pl.cdiv(M, tm),)
    return pl.pallas_call(
        functools.partial(_linear_kernel, relu=relu),
        grid=grid,
        in_specs=[pl.BlockSpec((tm, K), lambda i: (i, 0)),
                  pl.BlockSpec((K, N), lambda i: (0, 0)),
                  pl.BlockSpec((1, N), lambda i: (0, 0))],
        out_specs=pl.BlockSpec((tm, N), lambda i: (i, 0)),
        out_shape=jax.ShapeDtypeStruct((M, N), jnp.float32),
        compiler_params=_mp("parallel"),
    )(x.astype(jnp.float32), w.astype(BF), b.reshape(1, N).astype(jnp.float32))


# ------------------ fused LayerNorm + linear (+bias, +relu), row-tiled ----------------
def _ln_linear_kernel(x_ref, g_ref, b_ref, w_ref, bias_ref, o_ref, *, eps, relu):
    x = x_ref[...]
    mean = jnp.mean(x, axis=-1, keepdims=True)
    xc = x - mean
    var = jnp.mean(xc * xc, axis=-1, keepdims=True)
    xn = xc * jax.lax.rsqrt(var + eps) * g_ref[...] + b_ref[...]
    y = jax.lax.dot_general(xn.astype(BF), w_ref[...],
                            (((1,), (0,)), ((), ())),
                            preferred_element_type=jnp.float32)
    y = y + bias_ref[...]
    if relu:
        y = jnp.maximum(y, 0.0)
    o_ref[...] = y


def ln_linear(x, g, b, w, bias=None, relu=False, block_m=512):
    M, D = x.shape
    N = w.shape[1]
    if bias is None:
        bias = jnp.zeros((N,), jnp.float32)
    tm = min(block_m, M)
    grid = (pl.cdiv(M, tm),)
    return pl.pallas_call(
        functools.partial(_ln_linear_kernel, eps=1e-5, relu=relu),
        grid=grid,
        in_specs=[pl.BlockSpec((tm, D), lambda i: (i, 0)),
                  pl.BlockSpec((1, D), lambda i: (0, 0)),
                  pl.BlockSpec((1, D), lambda i: (0, 0)),
                  pl.BlockSpec((D, N), lambda i: (0, 0)),
                  pl.BlockSpec((1, N), lambda i: (0, 0))],
        out_specs=pl.BlockSpec((tm, N), lambda i: (i, 0)),
        out_shape=jax.ShapeDtypeStruct((M, N), jnp.float32),
        compiler_params=_mp("parallel"),
    )(x.astype(jnp.float32), g.reshape(1, D).astype(jnp.float32),
      b.reshape(1, D).astype(jnp.float32), w.astype(BF),
      bias.reshape(1, N).astype(jnp.float32))


# --------------- fused LayerNorm + bias-free qkv projection -> bf16 q (scaled), k, v ----------
def _ln_qkv_kernel(x_ref, g_ref, b_ref, wq_ref, wk_ref, wv_ref, q_ref, k_ref, v_ref, *, eps):
    x = x_ref[...]
    mean = jnp.mean(x, axis=-1, keepdims=True)
    xc = x - mean
    var = jnp.mean(xc * xc, axis=-1, keepdims=True)
    xn = (xc * jax.lax.rsqrt(var + eps) * g_ref[...] + b_ref[...]).astype(BF)

    def mm(w_ref):
        return jax.lax.dot_general(xn, w_ref[...], (((1,), (0,)), ((), ())),
                                   preferred_element_type=jnp.float32)

    q_ref[...] = mm(wq_ref).astype(q_ref.dtype)
    k_ref[...] = mm(wk_ref).astype(k_ref.dtype)
    v_ref[...] = mm(wv_ref).astype(v_ref.dtype)


def ln_qkv(x, g, b, wq_scaled, wk, wv, block_m=512):
    M, D = x.shape
    N = wq_scaled.shape[1]
    tm = min(block_m, M)
    grid = (pl.cdiv(M, tm),)
    return pl.pallas_call(
        functools.partial(_ln_qkv_kernel, eps=1e-5),
        grid=grid,
        in_specs=[pl.BlockSpec((tm, D), lambda i: (i, 0)),
                  pl.BlockSpec((1, D), lambda i: (0, 0)),
                  pl.BlockSpec((1, D), lambda i: (0, 0)),
                  pl.BlockSpec((D, N), lambda i: (0, 0)),
                  pl.BlockSpec((D, N), lambda i: (0, 0)),
                  pl.BlockSpec((D, N), lambda i: (0, 0))],
        out_specs=[pl.BlockSpec((tm, N), lambda i: (i, 0))] * 3,
        out_shape=[jax.ShapeDtypeStruct((M, N), BF)] * 3,
        compiler_params=_mp("parallel"),
    )(x.astype(jnp.float32), g.reshape(1, D).astype(jnp.float32),
      b.reshape(1, D).astype(jnp.float32),
      wq_scaled.astype(BF), wk.astype(BF), wv.astype(BF))


# ---------------- Nystrom attention: landmark means (streaming reduction, no int div) ----------------
def _landmark_kernel(q_ref, k_ref, ql_ref, kl_ref, *, l, m, n, pad, tk):
    step = pl.program_id(0)

    @pl.when(step == 0)
    def _():
        ql_ref[...] = jnp.zeros_like(ql_ref)
        kl_ref[...] = jnp.zeros_like(kl_ref)

    q = q_ref[...]
    k = k_ref[...]
    start = step * tk
    if n % tk != 0:                                           # mask garbage rows of the partial tile
        rows = jax.lax.broadcasted_iota(jnp.int32, (tk, 1), 0) + start
        valid = rows < n
        q = jnp.where(valid, q, jnp.zeros_like(q))
        k = jnp.where(valid, k, jnp.zeros_like(k))

    # 0/1 group-selection matrix (front pad folded into the column index, no integer divide)
    col_p = jax.lax.broadcasted_iota(jnp.int32, (m, tk), 1) + (start + pad)
    row_lo = jax.lax.broadcasted_iota(jnp.int32, (m, tk), 0) * l
    a = ((col_p >= row_lo) & (col_p < row_lo + l)).astype(BF)

    ql_ref[...] += jax.lax.dot_general(a, q, (((1,), (0,)), ((), ())),
                                       preferred_element_type=jnp.float32)
    kl_ref[...] += jax.lax.dot_general(a, k, (((1,), (0,)), ((), ())),
                                       preferred_element_type=jnp.float32)

    @pl.when(step == pl.num_programs(0) - 1)
    def _():
        ql_ref[...] = ql_ref[...] / l
        kl_ref[...] = kl_ref[...] / l


def landmark_means(q, k, *, l, m, n, pad):
    dim = q.shape[1]
    tk = min(4096, n)
    grid = (pl.cdiv(n, tk),)
    return pl.pallas_call(
        functools.partial(_landmark_kernel, l=l, m=m, n=n, pad=pad, tk=tk),
        grid=grid,
        in_specs=[pl.BlockSpec((tk, dim), lambda i: (i, 0)),
                  pl.BlockSpec((tk, dim), lambda i: (i, 0))],
        out_specs=[pl.BlockSpec((m, dim), lambda i: (0, 0)),
                   pl.BlockSpec((m, dim), lambda i: (0, 0))],
        out_shape=[jax.ShapeDtypeStruct((m, dim), jnp.float32),
                   jax.ShapeDtypeStruct((m, dim), jnp.float32)],
        compiler_params=_mp("arbitrary"),
    )(q, k)


# ------------- attn2 + Moore-Penrose pinv + apply to (attn3 @ v): block-diagonal formulation -------------
# TODO(synk): sized for hm = heads*num_landmarks <= ~512 (dim <= 128); larger dims would need
#             a per-head batched fallback to keep the (hm, hm) f32 matrices in VMEM.
def _pinv_apply_kernel(qlbd_ref, klbd_ref, w3v_ref, o_ref, *, heads, m, d_head, iters):
    hm = heads * m
    dim = heads * d_head
    ql = qlbd_ref[...]                                     # (hm, dim) block-diag, q pre-scaled
    kl = klbd_ref[...]                                     # (dim, hm) block-diag

    def mm(a, b):
        return jax.lax.dot_general(a, b, (((1,), (0,)), ((), ())),
                                   preferred_element_type=jnp.float32)

    s2 = mm(ql, kl)                                        # (hm, hm), block-diagonal by construction
    r_id = jax.lax.broadcasted_iota(jnp.int32, (hm, hm), 0) // m
    c_id = jax.lax.broadcasted_iota(jnp.int32, (hm, hm), 1) // m
    bd = r_id == c_id
    s2 = jnp.where(bd, s2, -jnp.inf)                       # restrict softmax to each head's block
    s2 = s2 - jnp.max(s2, axis=-1, keepdims=True)
    e = jnp.exp(s2)
    attn2 = e / jnp.sum(e, axis=-1, keepdims=True)         # block-diag, rows sum to 1

    absx = jnp.abs(attn2)
    col = jnp.sum(absx, axis=-1)
    row = jnp.sum(absx, axis=-2)
    denom = jnp.max(col) * jnp.max(row)                    # global scalar (torch.max semantics)

    z = jnp.transpose(attn2) / denom
    eye = (jax.lax.broadcasted_iota(jnp.int32, (hm, hm), 0) ==
           jax.lax.broadcasted_iota(jnp.int32, (hm, hm), 1)).astype(jnp.float32)

    x = attn2
    for _ in range(iters):                                 # Newton iteration, closed under block-diag
        xz = mm(x, z)
        inner = 7.0 * eye - xz
        inner = 15.0 * eye - mm(xz, inner)
        inner = 13.0 * eye - mm(xz, inner)
        z = 0.25 * mm(z, inner)

    # keep only each head's own d_head columns of (attn3 @ v), then apply z
    rd = jax.lax.broadcasted_iota(jnp.int32, (hm, dim), 0) // m
    cd = jax.lax.broadcasted_iota(jnp.int32, (hm, dim), 1) // d_head
    w3v = jnp.where(rd == cd, w3v_ref[...], 0.0)
    o_ref[...] = mm(z, w3v).astype(o_ref.dtype)


def pinv_apply(ql_bd, kl_bd, w3v, *, heads, m, d_head, iters):
    hm = heads * m
    dim = heads * d_head
    return pl.pallas_call(
        functools.partial(_pinv_apply_kernel, heads=heads, m=m, d_head=d_head, iters=iters),
        grid=(1,),
        in_specs=[pl.BlockSpec((hm, dim), lambda i: (0, 0)),
                  pl.BlockSpec((dim, hm), lambda i: (0, 0)),
                  pl.BlockSpec((hm, dim), lambda i: (0, 0))],
        out_specs=pl.BlockSpec((hm, dim), lambda i: (0, 0)),
        out_shape=jax.ShapeDtypeStruct((hm, dim), BF),
        compiler_params=_mp("arbitrary"),
    )(ql_bd.astype(jnp.float32), kl_bd.astype(jnp.float32), w3v.astype(jnp.float32))


# ------------- attn3 @ v : streaming online-softmax reduction over the (unpadded) sequence -------------
def _attn3v_kernel(qlbd_ref, k_ref, v_ref, o_ref, m_sc, l_sc, acc_sc, *, n, pad, tk):
    step = pl.program_id(0)

    @pl.when(step == 0)
    def _():
        if pad > 0:
            # front-pad rows have k == 0 -> score exactly 0, v == 0 -> no value contribution
            m_sc[...] = jnp.zeros_like(m_sc)
            l_sc[...] = jnp.full_like(l_sc, float(pad))
        else:
            m_sc[...] = jnp.full_like(m_sc, -jnp.inf)
            l_sc[...] = jnp.zeros_like(l_sc)
        acc_sc[...] = jnp.zeros_like(acc_sc)

    k = k_ref[...]
    v = v_ref[...]
    s = jax.lax.dot_general(qlbd_ref[...], k, (((1,), (1,)), ((), ())),
                            preferred_element_type=jnp.float32)       # (hm, tk)
    start = step * tk
    if n % tk != 0:                                                   # mask partial tile
        cols = jax.lax.broadcasted_iota(jnp.int32, (1, tk), 1) + start
        s = jnp.where(cols < n, s, -jnp.inf)
        rows = jax.lax.broadcasted_iota(jnp.int32, (tk, 1), 0) + start
        v = jnp.where(rows < n, v, jnp.zeros_like(v))

    m_new = jnp.maximum(m_sc[...], jnp.max(s, axis=-1, keepdims=True))
    alpha = jnp.exp(m_sc[...] - m_new)
    p = jnp.exp(s - m_new)
    l_sc[...] = alpha * l_sc[...] + jnp.sum(p, axis=-1, keepdims=True)
    acc_sc[...] = alpha * acc_sc[...] + jax.lax.dot_general(
        p.astype(BF), v, (((1,), (0,)), ((), ())),
        preferred_element_type=jnp.float32)
    m_sc[...] = m_new

    @pl.when(step == pl.num_programs(0) - 1)
    def _():
        o_ref[...] = acc_sc[...] / l_sc[...]


def attn3_times_v(ql_bd, k, v, *, n, pad):
    hm, dim = ql_bd.shape
    tk = min(4096, n)
    grid = (pl.cdiv(n, tk),)
    return pl.pallas_call(
        functools.partial(_attn3v_kernel, n=n, pad=pad, tk=tk),
        grid=grid,
        in_specs=[pl.BlockSpec((hm, dim), lambda i: (0, 0)),
                  pl.BlockSpec((tk, dim), lambda i: (i, 0)),
                  pl.BlockSpec((tk, dim), lambda i: (i, 0))],
        out_specs=pl.BlockSpec((hm, dim), lambda i: (0, 0)),
        out_shape=jax.ShapeDtypeStruct((hm, dim), jnp.float32),
        scratch_shapes=[pltpu.VMEM((hm, 1), jnp.float32),
                        pltpu.VMEM((hm, 1), jnp.float32),
                        pltpu.VMEM((hm, dim), jnp.float32)],
        compiler_params=_mp("arbitrary"),
    )(ql_bd, k, v)


# ----- attn1 @ M + 33-tap residual conv (haloed v via in-kernel DMA) + out-proj + residual, tiled -----
def _attn_out_kernel(q_ref, klbd_ref, m_ref, sumbd_ref, wres_ref, ow_ref, ob_ref,
                     x_ref, vhbm_ref, o_ref, vbuf, sem, *, heads, m, tn, halo):
    i = pl.program_id(0)
    cp = pltpu.make_async_copy(vhbm_ref.at[pl.ds(i * tn, tn + 2 * halo), :], vbuf, sem)
    cp.start()

    s1 = jax.lax.dot_general(q_ref[...], klbd_ref[...], (((1,), (0,)), ((), ())),
                             preferred_element_type=jnp.float32)      # (tn, heads*m)

    # per-head max via lane slices; per-head softmax sums via one MXU matmul vs block-diag ones
    mx_parts = []
    for hh in range(heads):
        sl = s1[:, hh * m:(hh + 1) * m]
        mx_parts.append(jnp.broadcast_to(jnp.max(sl, axis=-1, keepdims=True), (tn, m)))
    mx = jnp.concatenate(mx_parts, axis=-1)
    e = jnp.exp(s1 - mx)
    denom = jax.lax.dot_general(e.astype(BF), sumbd_ref[...], (((1,), (0,)), ((), ())),
                                preferred_element_type=jnp.float32)
    attn1 = (e / denom).astype(BF)

    out = jax.lax.dot_general(attn1, m_ref[...], (((1,), (0,)), ((), ())),
                              preferred_element_type=jnp.float32)     # (tn, dim)

    cp.wait()
    vt = vbuf[...].astype(jnp.float32)                                # (tn + 2*halo, dim)
    w = wres_ref[...]                                                 # (33, dim)
    ktaps = w.shape[0]
    accs = [None, None, None, None]
    for t in range(ktaps):
        term = vt[t:t + tn, :] * w[t:t + 1, :]
        j = t % 4
        accs[j] = term if accs[j] is None else accs[j] + term
    out = out + ((accs[0] + accs[1]) + (accs[2] + accs[3]))

    y = jax.lax.dot_general(out.astype(BF), ow_ref[...], (((1,), (0,)), ((), ())),
                            preferred_element_type=jnp.float32)
    o_ref[...] = y + ob_ref[...] + x_ref[...]


def attn_output(q, kl_bd, m_bd, v, wres, out_w, out_b, x_res, sum_bd, *, heads, m, block_n=1024):
    n, dim = q.shape
    hm = heads * m
    ktaps = wres.shape[0]
    halo = ktaps // 2
    tn = min(block_n, n)
    nt = pl.cdiv(n, tn)
    v_halo = jnp.pad(v, ((halo, halo + nt * tn - n), (0, 0)))          # bf16, zero halo
    return pl.pallas_call(
        functools.partial(_attn_out_kernel, heads=heads, m=m, tn=tn, halo=halo),
        grid=(nt,),
        in_specs=[pl.BlockSpec((tn, dim), lambda i: (i, 0)),           # q (bf16, pre-scaled)
                  pl.BlockSpec((dim, hm), lambda i: (0, 0)),           # k_l block-diag
                  pl.BlockSpec((hm, dim), lambda i: (0, 0)),           # z @ (attn3 @ v) block-diag
                  pl.BlockSpec((hm, hm), lambda i: (0, 0)),            # block-diag ones (sum matrix)
                  pl.BlockSpec((ktaps, dim), lambda i: (0, 0)),        # residual-conv taps
                  pl.BlockSpec((dim, dim), lambda i: (0, 0)),          # out projection
                  pl.BlockSpec((1, dim), lambda i: (0, 0)),            # out bias
                  pl.BlockSpec((tn, dim), lambda i: (i, 0)),           # residual input x
                  pl.BlockSpec(memory_space=pl.ANY)],                  # haloed v (HBM, manual DMA)
        out_specs=pl.BlockSpec((tn, dim), lambda i: (i, 0)),
        out_shape=jax.ShapeDtypeStruct((n, dim), jnp.float32),
        scratch_shapes=[pltpu.VMEM((tn + 2 * halo, dim), BF),
                        pltpu.SemaphoreType.DMA],
        compiler_params=_mp("parallel"),
    )(q, kl_bd, m_bd, sum_bd, wres.astype(jnp.float32), out_w.astype(BF),
      out_b.reshape(1, dim).astype(jnp.float32), x_res.astype(jnp.float32), v_halo)


# ----------------------------------- glue helpers -----------------------------------
def _block_diag_rows(x, heads):
    """(m, h*d) -> (h*m, h*d) block-diagonal (row-block h holds head h's columns)."""
    m, dim = x.shape
    d = dim // heads
    xh = x.reshape(m, heads, d)
    eye = jnp.eye(heads, dtype=x.dtype)
    return jnp.einsum('hg,mgd->hmgd', eye, xh).reshape(heads * m, dim)


def _block_diag_cols(x, heads):
    """(m, h*d) -> (h*d, h*m) block-diagonal with per-head blocks transposed."""
    m, dim = x.shape
    d = dim // heads
    xh = x.reshape(m, heads, d)
    eye = jnp.eye(heads, dtype=x.dtype)
    return jnp.einsum('hg,mgd->gdhm', eye, xh).reshape(dim, heads * m)


# ---------------------------------- TransLayer ---------------------------------------
def trans_layer(x, p, *, heads, d_head, num_landmarks, pinv_iters):
    n, dim = x.shape
    m = num_landmarks
    l = math.ceil(n / m)
    n_pad = m * l
    pad = n_pad - n
    scale = d_head ** -0.5
    ap = p["attn"]

    # fused LayerNorm + bias-free qkv projection; softmax scale folded into Wq.
    wq = ap["qkv_w"][:, :dim] * scale
    wk = ap["qkv_w"][:, dim:2 * dim]
    wv = ap["qkv_w"][:, 2 * dim:]
    q, k, v = ln_qkv(x, p["norm_g"], p["norm_b"], wq, wk, wv)           # (n, dim) bf16 each

    # landmark means (front zero-padding handled via shifted group index)
    q_l, k_l = landmark_means(q, k, l=l, m=m, n=n, pad=pad)             # (m, dim) f32

    ql_bd = _block_diag_rows(q_l, heads)                                # (h*m, dim)
    kl_bd = _block_diag_cols(k_l, heads)                                # (dim, h*m)

    # streaming attn3 @ v (online softmax over the key axis; pad columns folded analytically)
    w3v = attn3_times_v(ql_bd.astype(BF), k, v, n=n, pad=pad)           # (h*m, dim) f32

    # attn2 softmax + Moore-Penrose pinv + apply to (attn3 @ v), block-diagonal over heads
    m_bd = pinv_apply(ql_bd, kl_bd, w3v, heads=heads, m=m, d_head=d_head,
                      iters=pinv_iters)                                 # (h*m, dim) bf16

    # out = attn1 @ m_bd + res_conv(v); fused out-proj + bias + residual add with x
    wres = jnp.repeat(ap["res_w"].T, d_head, axis=1)                    # (33, dim) per-lane taps
    hid = jnp.arange(heads * m) // m
    sum_bd = (hid[:, None] == hid[None, :]).astype(BF)                  # block-diag ones
    out = attn_output(q, kl_bd.astype(BF), m_bd, v, wres, ap["out_w"], ap["out_b"],
                      x, sum_bd, heads=heads, m=m)                      # (n, dim) f32
    # TODO(synk): nn.Dropout(0.1) in NystromAttention.to_out is identity at inference.
    return out


# ------------------------- PEG (three depthwise conv2d's, H-tiled, in-kernel halo DMA) -------------------------
def _peg_kernel(w7_ref, w5_ref, w3_ref, bias_ref, xhbm_ref, o_ref, xbuf, sem, *, th, W):
    i = pl.program_id(0)
    cp = pltpu.make_async_copy(xhbm_ref.at[pl.ds(i * th, th + 6), :, :], xbuf, sem)
    cp.start()
    cp.wait()
    # TODO(synk): C=64 leaves vregs half-masked; channel packing to 128 lanes not applied.
    x = xbuf[...]                                # (th + 6, W + 6, C)
    w7 = w7_ref[...]
    w5 = w5_ref[...]
    w3 = w3_ref[...]
    taps = ([(0, kh, kw, w7) for kh in range(7) for kw in range(7)] +
            [(1, kh, kw, w5) for kh in range(5) for kw in range(5)] +
            [(2, kh, kw, w3) for kh in range(3) for kw in range(3)])
    accs = [x[3:3 + th, 3:3 + W, :] + bias_ref[...], None, None, None]
    for t, (off, kh, kw, w) in enumerate(taps):
        term = x[off + kh:off + kh + th, off + kw:off + kw + W, :] * w[kh:kh + 1, kw:kw + 1, :]
        j = t % 4
        accs[j] = term if accs[j] is None else accs[j] + term
    o_ref[...] = (accs[0] + accs[1]) + (accs[2] + accs[3])


def peg(x_hwc, p, H, W):
    C = x_hwc.shape[-1]
    th = min(H, 32)
    nt = pl.cdiv(H, th)
    xp = jnp.pad(x_hwc, ((3, 3 + nt * th - H), (3, 3), (0, 0))).astype(jnp.float32)
    bias = (p["b7"] + p["b5"] + p["b3"]).reshape(1, 1, C)
    return pl.pallas_call(
        functools.partial(_peg_kernel, th=th, W=W),
        grid=(nt,),
        in_specs=[pl.BlockSpec((7, 7, C), lambda i: (0, 0, 0)),
                  pl.BlockSpec((5, 5, C), lambda i: (0, 0, 0)),
                  pl.BlockSpec((3, 3, C), lambda i: (0, 0, 0)),
                  pl.BlockSpec((1, 1, C), lambda i: (0, 0, 0)),
                  pl.BlockSpec(memory_space=pl.ANY)],
        out_specs=pl.BlockSpec((th, W, C), lambda i: (i, 0, 0)),
        out_shape=jax.ShapeDtypeStruct((H, W, C), jnp.float32),
        scratch_shapes=[pltpu.VMEM((th + 6, W + 6, C), jnp.float32),
                        pltpu.SemaphoreType.DMA],
        compiler_params=_mp("parallel"),
    )(p["w7"].astype(jnp.float32), p["w5"].astype(jnp.float32),
      p["w3"].astype(jnp.float32), bias.astype(jnp.float32), xp)


# ------------------------------------- model ----------------------------------------
def transmil_peg_forward(x, params, *, dim, heads):
    d_head = dim // heads
    attn_kw = dict(heads=heads, d_head=d_head, num_landmarks=dim // 2, pinv_iters=6)

    h = linear(x, params["fc1_w"], params["fc1_b"], relu=True)          # (N, dim)
    N = h.shape[0]
    _H = _W = int(math.ceil(math.sqrt(N)))
    add_length = _H * _W - N
    if add_length > 0:
        h = jnp.concatenate([h, h[:add_length]], axis=0)                 # (_H*_W, dim)
    h = jnp.concatenate([params["cls_token"].reshape(1, dim), h], axis=0)

    h = trans_layer(h, params["layer1"], **attn_kw)

    cls_tok, feat = h[:1], h[1:]
    peg_out = peg(feat.reshape(_H, _W, dim), params["peg"], _H, _W)      # channels-last
    h = jnp.concatenate([cls_tok, peg_out.reshape(_H * _W, dim)], axis=0)

    h = trans_layer(h, params["layer2"], **attn_kw)

    # final LayerNorm only matters for the cls token -> fuse it with the first classifier FC
    y = ln_linear(h[:1], params["norm_g"], params["norm_b"],
                  params["fc2_w1"], params["fc2_b1"], relu=True)
    # TODO(synk): nn.Dropout(0.25) in _fc2 is identity at inference time.
    logits = linear(y, params["fc2_w2"], params["fc2_b2"], relu=False)
    return logits                                                        # (1, n_classes)


def init_params(key, dim, n_classes, heads):
    def nrm(k, shape, scale=0.02):
        return scale * jax.random.normal(k, shape, jnp.float32)

    keys = iter(jax.random.split(key, 32))

    def attn_params():
        return {"qkv_w": nrm(next(keys), (dim, 3 * dim)),
                "out_w": nrm(next(keys), (dim, dim)),
                "out_b": nrm(next(keys), (dim,)),
                "res_w": nrm(next(keys), (heads, 33))}

    return {
        "fc1_w": nrm(next(keys), (768, dim)),
        "fc1_b": nrm(next(keys), (dim,)),
        "cls_token": nrm(next(keys), (1, 1, dim), scale=1.0),
        "layer1": {"norm_g": jnp.ones((dim,), jnp.float32),
                   "norm_b": jnp.zeros((dim,), jnp.float32),
                   "attn": attn_params()},
        "layer2": {"norm_g": jnp.ones((dim,), jnp.float32),
                   "norm_b": jnp.zeros((dim,), jnp.float32),
                   "attn": attn_params()},
        "peg": {"w7": nrm(next(keys), (7, 7, dim)), "b7": nrm(next(keys), (dim,)),
                "w5": nrm(next(keys), (5, 5, dim)), "b5": nrm(next(keys), (dim,)),
                "w3": nrm(next(keys), (3, 3, dim)), "b3": nrm(next(keys), (dim,))},
        "norm_g": jnp.ones((dim,), jnp.float32),
        "norm_b": jnp.zeros((dim,), jnp.float32),
        "fc2_w1": nrm(next(keys), (dim, dim)), "fc2_b1": nrm(next(keys), (dim,)),
        "fc2_w2": nrm(next(keys), (dim, n_classes)), "fc2_b2": nrm(next(keys), (n_classes,)),
    }


if __name__ == "__main__":
    DIM = 64            # TransMIL_peg(n_classes, dim=64) -> heads=8, dim_head=8, landmarks=32
    HEADS = 8
    N_CLASSES = 3
    N_INSTANCES = 7     # -> _H = _W = 3, seq = 10, Nystrom front-pads (analytically) to 32

    key = jax.random.PRNGKey(0)
    kx, kp = jax.random.split(key)
    x = jax.random.normal(kx, (N_INSTANCES, 768), jnp.float32)
    params = init_params(kp, DIM, N_CLASSES, HEADS)

    logits = transmil_peg_forward(x, params, dim=DIM, heads=HEADS)
    logits = jax.block_until_ready(logits)
    assert logits.shape == (1, N_CLASSES)
    assert bool(jnp.all(jnp.isfinite(logits)))
    print("KERNEL_OK")
</pallas_src>

<mosaic_0001>
module attributes {stable_mosaic.version = 11 : i64} {
  func.func @_linear_kernel(%arg0: i32, %arg1: memref<7x768xf32, #tpu.memory_space<vmem>>, %arg2: memref<768x64xbf16, #tpu.memory_space<vmem>>, %arg3: memref<1x64xf32, #tpu.memory_space<vmem>>, %arg4: memref<7x64xf32, #tpu.memory_space<vmem>>) attributes {dimension_semantics = [#tpu.dimension_semantics<parallel>], iteration_bounds = array<i64: 1>, scalar_prefetch = 0 : i64, scratch_operands = 0 : i64, tpu.core_type = #tpu.core_type<tc>, window_params = [{transform_indices = @transform_0, window_bounds = array<i64: 7, 768>}, {pipeline_mode = #tpu.pipeline_mode<synchronous>, transform_indices = @transform_1, window_bounds = array<i64: 768, 64>}, {pipeline_mode = #tpu.pipeline_mode<synchronous>, transform_indices = @transform_2, window_bounds = array<i64: 1, 64>}, {transform_indices = @transform_3, window_bounds = array<i64: 7, 64>}]} {
    %c0 = arith.constant 0 : index
    %c0_0 = arith.constant 0 : index
    %0 = vector.load %arg1[%c0, %c0_0] : memref<7x768xf32, #tpu.memory_space<vmem>>, vector<7x768xf32>
    %1 = arith.truncf %0 : vector<7x768xf32> to vector<7x768xbf16>
    %c0_1 = arith.constant 0 : index
    %c0_2 = arith.constant 0 : index
    %2 = vector.load %arg2[%c0_1, %c0_2] : memref<768x64xbf16, #tpu.memory_space<vmem>>, vector<768x64xbf16>
    %cst = arith.constant dense<0.000000e+00> : vector<7x64xf32>
    %3 = tpu.matmul %1, %2, %cst {dimension_numbers = #tpu.dot_dimension_numbers<[1], [0], [0], [1], [0, 0, 1, 1], [], []>} : vector<7x768xbf16>, vector<768x64xbf16>, vector<7x64xf32> -> vector<7x64xf32>
    %c0_3 = arith.constant 0 : index
    %c0_4 = arith.constant 0 : index
    %4 = vector.load %arg3[%c0_3, %c0_4] : memref<1x64xf32, #tpu.memory_space<vmem>>, vector<1x64xf32>
    %5 = vector.broadcast %4 : vector<1x64xf32> to vector<7x64xf32>
    %6 = arith.addf %3, %5 : vector<7x64xf32>
    %cst_5 = arith.constant 0.000000e+00 : f32
    %7 = vector.broadcast %cst_5 : f32 to vector<7x64xf32>
    %8 = arith.maximumf %6, %7 : vector<7x64xf32>
    %c0_6 = arith.constant 0 : index
    %c0_7 = arith.constant 0 : index
    %9 = vector.load %arg4[%c0_6, %c0_7] : memref<7x64xf32, #tpu.memory_space<vmem>>, vector<7x64xf32>
    tpu.vector_store %arg4[%c0_6, %c0_7], %8 {strides = array<i32>} : memref<7x64xf32, #tpu.memory_space<vmem>>, vector<7x64xf32>,
    return
  }
  func.func @transform_0(%arg0: i32) -> (i32, i32) {
    %c0_i32 = arith.constant 0 : i32
    %c0_i32_0 = arith.constant 0 : i32
    return %arg0, %c0_i32 : i32, i32
  }
  func.func @transform_1(%arg0: i32) -> (i32, i32) {
    %c0_i32 = arith.constant 0 : i32
    %c0_i32_0 = arith.constant 0 : i32
    %c0_i32_1 = arith.constant 0 : i32
    return %c0_i32, %c0_i32_0 : i32, i32
  }
  func.func @transform_2(%arg0: i32) -> (i32, i32) {
    %c0_i32 = arith.constant 0 : i32
    %c0_i32_0 = arith.constant 0 : i32
    %c0_i32_1 = arith.constant 0 : i32
    return %c0_i32, %c0_i32_0 : i32, i32
  }
  func.func @transform_3(%arg0: i32) -> (i32, i32) {
    %c0_i32 = arith.constant 0 : i32
    %c0_i32_0 = arith.constant 0 : i32
    return %arg0, %c0_i32 : i32, i32
  }
}

</mosaic_0001>

<bundles_post_ra>
// kernel: tpu_custom_call.1
= control target key start
LH: loop header
LB: loop body
LE: loop exit
PB: predicated region body
PF: predicated region fallthrough
CT: control target
= control target key end

     0   :  { %s931_s0 = inlined_call_operand.vmem [shape: f32[7,768], index: 0, kind: input, shape index: {}]   ;;  %s932_s1 = inlined_call_operand.vmem [shape: bf16[768,64], index: 1, kind: input, shape index: {}]   ;;  %s933_s2 = inlined_call_operand.vmem [shape: f32[1,64], index: 2, kind: input, shape index: {}]   ;;  %s934_s3 = inlined_call_operand.hbm [shape: f32[7,64], index: 3, kind: output, shape index: {}]  }
   0x1   :  { %v672_v0 = vld [vmem:[%s932_s1 + $0x78] sm:$0xff]   ;;  %v676_v4 = vld [vmem:[%s932_s1 + $0x70] sm:$0xff]   ;;  %v680_v8 = vld [vmem:[%s932_s1 + $0x68] sm:$0xff]  }
   0x2   :  { %v673_v1 = vld [vmem:[%s932_s1 + $0x38] sm:$0xff]   ;;  %605 = vmatprep.subr.bf16.mxu0 %v672_v0  ;;  %v677_v5 = vld [vmem:[%s932_s1 + $0x30] sm:$0xff]   ;;  %v681_v9 = vld [vmem:[%s932_s1 + $0x28] sm:$0xff]  }
   0x3   :  { %v674_v2 = vld [vmem:[%s932_s1 + $0xf8] sm:$0xff]   ;;  %606 = vmatpush3.bf16.msra.mxu0 %v673_v1  ;;  %v678_v6 = vld [vmem:[%s932_s1 + $0xf0] sm:$0xff]   ;;  %v682_v10 = vld [vmem:[%s932_s1 + $0xe8] sm:$0xff]  }
   0x4   :  { %v675_v3 = vld [vmem:[%s932_s1 + $0xb8] sm:$0xff]   ;;  %627 = vmatprep.subr.bf16.mxu1 %v674_v2  ;;  %607 = vmatprep.subr.bf16.mxu0 %v676_v4  ;;  %v679_v7 = vld [vmem:[%s932_s1 + $0xb0] sm:$0xff]   ;;  %v683_v11 = vld [vmem:[%s932_s1 + $0xa8] sm:$0xff]  }
   0x5   :  { %628 = vmatpush3.bf16.msra.mxu1 %v675_v3  ;;  %v684_v12 = vld [vmem:[%s932_s1 + $0x60] sm:$0xff]   ;;  %v688_v16 = vld [vmem:[%s932_s1 + $0x58] sm:$0xff]   ;;  %v692_v20 = vld [vmem:[%s932_s1 + $0x50] sm:$0xff]  }
   0x6   :  { %629 = vmatprep.subr.bf16.mxu1 %v678_v6  ;;  %v685_v13 = vld [vmem:[%s932_s1 + $0x20] sm:$0xff]   ;;  %v689_v17 = vld [vmem:[%s932_s1 + $0x18] sm:$0xff]   ;;  %v693_v21 = vld [vmem:[%s932_s1 + $0x10] sm:$0xff]  }
   0x7   :  { %608 = vmatpush3.bf16.msra.mxu0 %v677_v5  ;;  %v686_v14 = vld [vmem:[%s932_s1 + $0xe0] sm:$0xff]   ;;  %v690_v18 = vld [vmem:[%s932_s1 + $0xd8] sm:$0xff]   ;;  %v694_v22 = vld [vmem:[%s932_s1 + $0xd0] sm:$0xff]  }
   0x8   :  { %609 = vmatprep.subr.bf16.mxu0 %v680_v8  ;;  %v687_v15 = vld [vmem:[%s932_s1 + $0xa0] sm:$0xff]   ;;  %v691_v19 = vld [vmem:[%s932_s1 + $0x98] sm:$0xff]   ;;  %v695_v23 = vld [vmem:[%s932_s1 + $0x90] sm:$0xff]  }
   0x9   :  { %630 = vmatpush3.bf16.msra.mxu1 %v679_v7  ;;  %v696_v24 = vld [vmem:[%s932_s1 + $0x48] sm:$0xff]   ;;  %v700_v28 = vld [vmem:[%s932_s1 + $0x40] sm:$0xff]   ;;  %v704_v36 = vld [vmem:[%s932_s1 + $0x178] sm:$0xff]  }
   0xa   :  { %631 = vmatprep.subr.bf16.mxu1 %v682_v10  ;;  %v697_v25 = vld [vmem:[%s932_s1 + $0x8] sm:$0xff]   ;;  %v701_v29 = vld [vmem:[%s932_s1] sm:$0xff]   ;;  %v19_v37 = vld [vmem:[%s931_s0 + $0x18] sm:$0x7f] }
   0xb   :  { %610 = vmatpush3.bf16.msra.mxu0 %v681_v9  ;;  %v698_v26 = vld [vmem:[%s932_s1 + $0xc8] sm:$0xff]   ;;  %v702_v30 = vld [vmem:[%s932_s1 + $0xc0] sm:$0xff]   ;;  %v25_v38 = vpack.c.bf16 %v19_v37, %v19_v37  ;;  %v705_v39 = vld [vmem:[%s932_s1 + $0x138] sm:$0xff]  }
   0xc   :  { %611 = vmatprep.subr.bf16.mxu0 %v684_v12  ;;  %v699_v27 = vld [vmem:[%s932_s1 + $0x88] sm:$0xff]   ;;  %v703_v33 = vld [vmem:[%s932_s1 + $0x80] sm:$0xff]   ;;  %v18_v40 = vld [vmem:[%s931_s0 + $0x10] sm:$0x7f] }
   0xd   :  { %632 = vmatpush3.bf16.msra.mxu1 %v683_v11  ;;  %v17_v31 = vld [vmem:[%s931_s0 + $0x8] sm:$0x7f]  ;;  %v16_v34 = vld [vmem:[%s931_s0] sm:$0x7f]  ;;  %491 = vmatprep.mubr.bf16.mxu1 %v25_v38  ;;  %v24_v41 = vpack.c.bf16 %v18_v40, %v18_v40  ;;  %v706_v42 = vld [vmem:[%s932_s1 + $0x170] sm:$0xff]  }
   0xe   :  { %633 = vmatprep.subr.bf16.mxu1 %v686_v14  ;;  %v23_v32 = vpack.c.bf16 %v17_v31, %v17_v31  ;;  %v22_v35 = vpack.c.bf16 %v16_v34, %v16_v34  ;;  %v707_v43 = vld [vmem:[%s932_s1 + $0x130] sm:$0xff]   ;;  %v708_v44 = vld [vmem:[%s932_s1 + $0x168] sm:$0xff]   ;;  %v710_v46 = vld [vmem:[%s932_s1 + $0x160] sm:$0xff]  }
   0xf   :  { %612 = vmatpush3.bf16.msra.mxu0 %v685_v13  ;;  %v709_v45 = vld [vmem:[%s932_s1 + $0x128] sm:$0xff]   ;;  %v711_v47 = vld [vmem:[%s932_s1 + $0x120] sm:$0xff]   ;;  %v712_v48 = vld [vmem:[%s932_s1 + $0x158] sm:$0xff]  }
  0x10   :  { %613 = vmatprep.subr.bf16.mxu0 %v688_v16  ;;  %451 = vmatprep.mubr.bf16.mxu0 %v23_v32  ;;  %v713_v49 = vld [vmem:[%s932_s1 + $0x118] sm:$0xff]   ;;  %v714_v50 = vld [vmem:[%s932_s1 + $0x150] sm:$0xff]   ;;  %v21_v51 = vld [vmem:[%s931_s0 + $0x28] sm:$0x7f] }
  0x11   :  { %634 = vmatpush3.bf16.msra.mxu1 %v687_v15  ;;  %v27_v52 = vpack.c.bf16 %v21_v51, %v21_v51 }
  0x12   :  { %635 = vmatprep.subr.bf16.mxu1 %v690_v18 }
  0x13   :  { %614 = vmatpush3.bf16.msra.mxu0 %v689_v17 }
  0x14   :  { %615 = vmatprep.subr.bf16.mxu0 %v692_v20 }
  0x15   :  { %636 = vmatpush3.bf16.msra.mxu1 %v691_v19 }
  0x16   :  { %637 = vmatprep.subr.bf16.mxu1 %v694_v22 }
  0x17   :  { %616 = vmatpush3.bf16.msra.mxu0 %v693_v21 }
  0x18   :  { %617 = vmatprep.subr.bf16.mxu0 %v696_v24 }
  0x19   :  { %638 = vmatpush3.bf16.msra.mxu1 %v695_v23 }
  0x1a   :  { %639 = vmatprep.subr.bf16.mxu1 %v698_v26 }
  0x1b   :  { %618 = vmatpush3.bf16.msra.mxu0 %v697_v25 }
  0x1c   :  { %619 = vmatprep.subr.bf16.mxu0 %v700_v28 }
  0x1d   :  { %640 = vmatpush3.bf16.msra.mxu1 %v699_v27 }
  0x1e   :  { %641 = vmatprep.subr.bf16.mxu1 %v702_v30 }
  0x1f   :  { %620 = vmatpush3.bf16.msra.mxu0 %v701_v29 }
  0x20   :  { %649 = vmatprep.subr.bf16.mxu0 %v704_v36 }
  0x21   :  { %642 = vmatpush3.bf16.msra.mxu1 %v703_v33 }
  0x22   :  { %452 = vmatmul.mubr.bf16.vlgmr.msra.gmra.mxu0 %v22_v35 }
  0x23   :  { %650 = vmatpush3.bf16.msra.mxu0 %v705_v39 }
  0x24   :  { %492 = vmatmul.mubr.bf16.vlgmr.msra.gmra.mxu1 %v24_v41  ;;  %651 = vmatprep.subr.bf16.mxu0 %v706_v42 }
  0x27   :  { %652 = vmatpush3.bf16.msra.mxu0 %v707_v43 }
  0x28   :  { %653 = vmatprep.subr.bf16.mxu0 %v708_v44 }
  0x2b   :  { %654 = vmatpush3.bf16.msra.mxu0 %v709_v45 }
  0x2c   :  { %655 = vmatprep.subr.bf16.mxu0 %v710_v46 }
  0x2f   :  { %656 = vmatpush3.bf16.msra.mxu0 %v711_v47 }
  0x30   :  { %657 = vmatprep.subr.bf16.mxu0 %v712_v48 }
  0x31   :  { %8 = vsyncpa [#allocation3], 0  ;;  %v715_v53 = vld [vmem:[%s932_s1 + $0x110] sm:$0xff]   ;;  %531 = vmatprep.mubr.bf16.mxu0 %v27_v52  ;;  %v716_v54 = vld [vmem:[%s932_s1 + $0x148] sm:$0xff]   ;;  %vm540_vm0 = vcmask 522240  }
  0x32   :  { %v717_v55 = vld [vmem:[%s932_s1 + $0x108] sm:$0xff]   ;;  %v718_v56 = vld [vmem:[%s932_s1 + $0x140] sm:$0xff]  }
  0x33   :  { %658 = vmatpush3.bf16.msra.mxu0 %v713_v49  ;;  %v719_v57 = vld [vmem:[%s932_s1 + $0x100] sm:$0xff]  }
  0x34   :  { %659 = vmatprep.subr.bf16.mxu0 %v714_v50  ;;  %v20_v58 = vld [vmem:[%s931_s0 + $0x20] sm:$0x7f]  ;;  %s742_s0 = smov [#allocation2]  }
  0x35   :  { %v26_v59 = vpack.c.bf16 %v20_v58, %v20_v58  ;;  %v556_v5 = vld [vmem:[%s933_s2] ss:$0 sm:$0xff]  ;;  %s548_s1 = sshll.u32 %s742_s0, 4  ;;  %s549_s1 = int_to_ptr.vmem [resolvable:$true] %s548_s1 }
  0x36   :  { %s720_s14 = scalar_lea.vmem %s549_s1, 128  ;;  %p725_p1 = scmp.lt.s32.totalorder %s549_s1, %s549_s1 }
  0x37   :  { %660 = vmatpush3.bf16.msra.mxu0 %v715_v53  ;;  %p721_p0 = scmp.ne.s32.totalorder %s549_s1, %s720_s14  ;;  %p726_p2 = scmp.lt.s32.totalorder %s720_s14, %s720_s14 }
  0x38   :  { %661 = vmatprep.subr.bf16.mxu0 %v716_v54 }
  0x39   :  { %p727_p3 = por %p726_p2, %p725_p1 }
  0x3b   :  { %662 = vmatpush3.bf16.msra.mxu0 %v717_v55  ;;  %p728_p4 = pnand %p727_p3, %p721_p0 }
  0x3c   :  { %663 = vmatprep.subr.bf16.mxu0 %v718_v56 }
  0x3f   :  { %664 = vmatpush3.bf16.msra.mxu0 %v719_v57 }
  0x42   :  { %532 = vmatmul.mubr.bf16.vlgmr.msra.gmra.mxu0 %v26_v59 }
  0xe2   :  { %v621_v60 = vpop.f32.mrf.mxu0 }
  0xe4   :  { %v622_v61 = vpop.f32.mrf.mxu0  ;;  %v643_v62 = vpop.f32.mrf.mxu1 }
  0xe5   :  { %v623_v4 = vadd.f32 %v622_v61, %v621_v60 }
  0xe6   :  { %v624_v63 = vpop.f32.mrf.mxu0  ;;  %v644_v0 = vpop.f32.mrf.mxu1 }
  0xe7   :  { %v454_v6 = vadd.f32 %v623_v4, %v556_v5  ;;  %v645_v7 = vadd.f32 %v644_v0, %v643_v62 }
  0xe8   :  { %v625_v1 = vpop.f32.mrf.mxu0  ;;  %v646_v2 = vpop.f32.mrf.mxu1 }
  0xe9   :  { %v494_v10 = vadd.f32 %v645_v7, %v454_v6 }
  0xea   :  { %v647_v3 = vpop.f32.mrf.mxu1 }
 0x102   :  { %v665_v8 = vpop.f32.mrf.mxu0 }
 0x104   :  { %v666_v9 = vpop.f32.mrf.mxu0 }
 0x105   :  { %v667_v11 = vadd.f32 %v666_v9, %v665_v8 }
 0x106   :  { %v668_v12 = vpop.f32.mrf.mxu0 }
 0x107   :  { %v534_v13 = vadd.f32 %v667_v11, %v494_v10 }
 0x108   :  { %v669_v14 = vpop.f32.mrf.mxu0 }
 0x109   :  { %v539_v15 = vmax.f32 %v534_v13, 0.0 }
 0x10b   :  { %541 = vst.msk [vmem:[#allocation2] sm:$0x7f] %vm540_vm0, %v539_v15 }
 0x10c   :  { %731 = shalt.err (!%p728_p4)
}
 0x10d   :  { %551 = dma.vmem_to_hbm [thread:$0]  %s549_s1, 128, %s934_s3, [#allocation3]  }
 0x10e   :  { %740 = dma.done.wait [#allocation3], 128  }
 0x10f   :  { %741 = vsyncadd [#allocation3], 4294967168 }
 0x110   :  { %555 = vsyncpa [#allocation3], 1 }

</bundles_post_ra>
